<compile_context>
chip_gen: v7x
topology: tpu7x:2x2x1
jax: 0.10.0
libtpu: 0.0.40
codegen_flags: <defaults>
</compile_context>

<pallas_src>
import functools

import jax
import jax.numpy as jnp
from jax.experimental import pallas as pl
from jax.experimental.pallas import tpu as pltpu

BN_EPS = 1e-5
HALO = 128  # lane width of the left/right halo views of x


def _round_up(a, b):
    return ((a + b - 1) // b) * b


def _compiler_params(block_bytes, semantics):
    # Derived from the working set; cap keeps headroom on v7x's 64 MiB/TC VMEM.
    limit = int(min(max(32 << 20, 8 * block_bytes), 48 << 20))
    return pltpu.CompilerParams(dimension_semantics=semantics,
                                vmem_limit_bytes=limit)


def _masked_windows(xl_ref, xa_ref, xr_ref, j, K, padding, L_in, TL, dtype):
    """K statically shifted, zero-padded conv input windows, each (C_in, TL)."""
    base = j * TL
    lane_h = jax.lax.broadcasted_iota(jnp.int32, (1, HALO), 1)
    lane_a = jax.lax.broadcasted_iota(jnp.int32, (1, TL), 1)
    # Intended absolute input index of each lane of each view.  Lanes whose intended
    # index is outside [0, L_in) (conv zero padding, tile overhang past L, or a clamped
    # halo block) are zeroed before any arithmetic touches them.
    idx_l = lane_h + (base - HALO)
    idx_a = lane_a + base
    idx_r = lane_h + (base + TL)
    xl = jnp.where((idx_l >= 0) & (idx_l < L_in), xl_ref[0], 0.0)
    xa = jnp.where(idx_a < L_in, xa_ref[0], 0.0)
    xr = jnp.where(idx_r < L_in, xr_ref[0], 0.0)
    # Lane-aligned concat: (C_in, HALO + TL + HALO); slices below are tap shifts.
    xcat = jnp.concatenate([xl, xa, xr], axis=-1).astype(dtype)
    # TODO(synk): fold the K taps into a single (C_out, K*C_in) x (K*C_in, TL) matmul
    # once sublane concatenation of non-multiple-of-8 row groups is verified on all
    # targets; at these channel counts the kernel is HBM-bound so K small dots are free.
    return [xcat[:, HALO + k - padding: HALO + k - padding + TL] for k in range(K)]


def _make_stats_kernel(K, padding, L_in, L_out, TL):
    def kernel(xl_ref, xa_ref, xr_ref, w_ref, stats_ref):
        # w_ref: (K, C_out, C_in); stats_ref: (1, C_out, 2), resident across the j axis.
        j = pl.program_id(1)
        wins = _masked_windows(xl_ref, xa_ref, xr_ref, j, K, padding, L_in, TL,
                               w_ref.dtype)
        c_out = w_ref.shape[1]
        y = jnp.zeros((c_out, TL), jnp.float32)
        for k in range(K):  # static unroll, K is small
            y = y + jnp.dot(w_ref[k], wins[k], preferred_element_type=jnp.float32)

        # Mask output lanes beyond the true L_out before reducing.
        lane = jax.lax.broadcasted_iota(jnp.int32, (1, TL), 1)
        ym = jnp.where(j * TL + lane < L_out, y, 0.0)
        part = jnp.concatenate(
            [jnp.sum(ym, axis=1, keepdims=True),
             jnp.sum(ym * ym, axis=1, keepdims=True)], axis=1)  # (C_out, 2)

        # Output block index is constant in j -> accumulates in VMEM, one HBM write
        # per batch row when n advances.
        @pl.when(j == 0)
        def _():
            stats_ref[0] = part

        @pl.when(j > 0)
        def _():
            stats_ref[0] = stats_ref[0] + part

    return kernel


def _make_conv_bn_relu_kernel(K, padding, L_in, TL):
    def kernel(xl_ref, xa_ref, xr_ref, w_ref, shift_ref, o_ref):
        # w_ref: (K, C_out, C_in) with the BN scale pre-folded; shift_ref: (C_out, 1).
        j = pl.program_id(1)
        wins = _masked_windows(xl_ref, xa_ref, xr_ref, j, K, padding, L_in, TL,
                               w_ref.dtype)
        c_out = w_ref.shape[1]
        y = jnp.zeros((c_out, TL), jnp.float32)
        for k in range(K):
            y = y + jnp.dot(w_ref[k], wins[k], preferred_element_type=jnp.float32)
        o_ref[0] = jnp.maximum(y + shift_ref[...], 0.0).astype(o_ref.dtype)

    return kernel


@functools.partial(
    jax.jit,
    static_argnames=("kernel_size", "stride", "padding", "compute_dtype", "tile_l"),
)
def stem_block(x, weight, bias, gamma, beta, *, kernel_size=3, stride=1, padding=1,
               compute_dtype=jnp.bfloat16, tile_l=2048):
    """x: (N, C_in, L) f32; weight: (C_out, C_in, K). Returns (N, C_out, L_out) f32.

    `bias` is accepted for API parity with nn.Conv1d but unused: with training-mode
    BatchNorm (batch statistics) the conv bias is exactly cancelled by the mean
    subtraction.  It would have to be added back for eval-mode / running-stats BN.
    """
    assert stride == 1, "this kernel implements the module defaults (stride=1)"
    N, C_in, L = x.shape
    C_out, _, K = weight.shape
    assert K == kernel_size
    assert 0 <= padding <= HALO and 0 <= K - 1 - padding <= HALO, "halo must cover taps"
    assert tile_l % 128 == 0 and tile_l >= 128
    L_out = L + 2 * padding - K + 1
    assert L_out >= 1

    TL = min(tile_l, _round_up(L_out, 128))
    nT = pl.cdiv(L_out, TL)
    TLB = TL // 128
    n_xa = pl.cdiv(L, TL)    # TL-blocks of x along its length
    n_xh = pl.cdiv(L, HALO)  # 128-blocks of x along its length

    # x stays unpadded and uncast in HBM.  Clamped halo block indices are safe: a
    # clamped block's intended lanes are all outside [0, L) and get masked to zero.
    def xa_map(n, j):
        return (n, 0, jnp.minimum(j, n_xa - 1))

    def xl_map(n, j):
        return (n, 0, jnp.minimum(jnp.maximum(j * TLB - 1, 0), n_xh - 1))

    def xr_map(n, j):
        return (n, 0, jnp.minimum((j + 1) * TLB, n_xh - 1))

    x_specs = [
        pl.BlockSpec((1, C_in, HALO), xl_map),
        pl.BlockSpec((1, C_in, TL), xa_map),
        pl.BlockSpec((1, C_in, HALO), xr_map),
    ]
    w_spec = pl.BlockSpec((K, C_out, C_in), lambda n, j: (0, 0, 0))

    # Taps laid out (K, C_out, C_in): tap k is a ready (C_out, C_in) MXU operand.
    w_taps = jnp.transpose(weight, (2, 0, 1))

    x_bytes = C_in * (TL + 2 * HALO) * x.dtype.itemsize
    w_bytes = K * C_out * C_in * jnp.dtype(compute_dtype).itemsize

    # ---- Phase 1: streaming conv -> per-row partial BN stats (no conv output) -------
    stats = pl.pallas_call(
        _make_stats_kernel(K, padding, L, L_out, TL),
        grid=(N, nT),
        in_specs=x_specs + [w_spec],
        out_specs=pl.BlockSpec((1, C_out, 2), lambda n, j: (n, 0, 0)),
        out_shape=jax.ShapeDtypeStruct((N, C_out, 2), jnp.float32),
        compiler_params=_compiler_params(x_bytes + w_bytes + C_out * 2 * 4,
                                         ("parallel", "arbitrary")),
    )(x, x, x, w_taps.astype(compute_dtype))

    # ---- Tiny reduction + BN folding in plain JAX ------------------------------------
    tot = jnp.sum(stats, axis=0)                              # (C_out, 2)
    count = jnp.float32(N * L_out)
    mean = tot[:, 0] / count
    # TODO(synk): E[x^2]-E[x]^2 can cancel for very large N*L_out; switch to Chan's
    # parallel-variance combine if that regime matters.
    var = jnp.maximum(tot[:, 1] / count - mean * mean, 0.0)   # biased var (PyTorch BN)
    inv_std = jax.lax.rsqrt(var + BN_EPS)
    scale = gamma.astype(jnp.float32) * inv_std               # (C_out,)
    shift = (beta.astype(jnp.float32) - mean * scale).reshape(C_out, 1)
    w_scaled = (w_taps.astype(jnp.float32) * scale[None, :, None]).astype(compute_dtype)

    # ---- Phase 2: recompute conv, add shift, ReLU, write exact-shape output ---------
    out = pl.pallas_call(
        _make_conv_bn_relu_kernel(K, padding, L, TL),
        grid=(N, nT),
        in_specs=x_specs + [w_spec, pl.BlockSpec((C_out, 1), lambda n, j: (0, 0))],
        out_specs=pl.BlockSpec((1, C_out, TL), lambda n, j: (n, 0, j)),
        out_shape=jax.ShapeDtypeStruct((N, C_out, L_out), jnp.float32),
        compiler_params=_compiler_params(
            x_bytes + w_bytes + C_out * TL * 4 + C_out * 4,
            ("parallel", "parallel")),
    )(x, x, x, w_scaled, shift)

    return out


def reference_stem_block(x, weight, bias, gamma, beta, *, padding=1):
    """Independent plain-JAX reference (lax conv + train-mode BN + ReLU), f32."""
    y = jax.lax.conv_general_dilated(
        x, weight, window_strides=(1,), padding=[(padding, padding)],
        dimension_numbers=("NCH", "OIH", "NCH"))
    y = y + bias.reshape(1, -1, 1)
    mean = jnp.mean(y, axis=(0, 2), keepdims=True)
    var = jnp.mean((y - mean) ** 2, axis=(0, 2), keepdims=True)
    y = (y - mean) * jax.lax.rsqrt(var + BN_EPS)
    y = y * gamma.reshape(1, -1, 1) + beta.reshape(1, -1, 1)
    return jnp.maximum(y, 0.0)


if __name__ == "__main__":
    key = jax.random.PRNGKey(0)
    k_x, k_w, k_b, k_g, k_be = jax.random.split(key, 5)

    N, C_in, C_out, L, K = 2, 4, 8, 16, 3

    x = jax.random.normal(k_x, (N, C_in, L), dtype=jnp.float32)
    bound = 1.0 / (C_in * K) ** 0.5
    weight = jax.random.uniform(k_w, (C_out, C_in, K), jnp.float32, -bound, bound)
    bias = jax.random.uniform(k_b, (C_out,), jnp.float32, -bound, bound)
    gamma = 1.0 + 0.1 * jax.random.normal(k_g, (C_out,), dtype=jnp.float32)
    beta = 0.1 * jax.random.normal(k_be, (C_out,), dtype=jnp.float32)

    ref = reference_stem_block(x, weight, bias, gamma, beta)

    # Exact-precision path: f32 end to end, tight tolerance vs the lax reference.
    out_f32 = stem_block(x, weight, bias, gamma, beta, compute_dtype=jnp.float32)
    out_f32 = jax.block_until_ready(out_f32)
    assert out_f32.shape == (N, C_out, L)
    assert jnp.allclose(out_f32, ref, rtol=1e-4, atol=1e-5), "f32 kernel mismatch"

    # Fast path: bf16 into the MXU (f32 accumulate + f32 BN math), looser tolerance.
    out_bf16 = jax.block_until_ready(stem_block(x, weight, bias, gamma, beta))
    assert out_bf16.shape == (N, C_out, L)
    assert jnp.allclose(out_bf16, ref, rtol=5e-2, atol=5e-2), "bf16 kernel mismatch"

    print("KERNEL_OK")
</pallas_src>

<mosaic_0001>
module attributes {stable_mosaic.version = 11 : i64} {
  func.func @kernel(%arg0: i32, %arg1: i32, %arg2: memref<1x4x128xf32, #tpu.memory_space<vmem>>, %arg3: memref<1x4x128xf32, #tpu.memory_space<vmem>>, %arg4: memref<1x4x128xf32, #tpu.memory_space<vmem>>, %arg5: memref<3x8x4xf32, #tpu.memory_space<vmem>>, %arg6: memref<1x8x2xf32, #tpu.memory_space<vmem>>) attributes {dimension_semantics = [#tpu.dimension_semantics<parallel>, #tpu.dimension_semantics<arbitrary>], iteration_bounds = array<i64: 2, 1>, scalar_prefetch = 0 : i64, scratch_operands = 0 : i64, tpu.core_type = #tpu.core_type<tc>, window_params = [{transform_indices = @transform_0, window_bounds = array<i64: 1, 4, 128>}, {transform_indices = @transform_1, window_bounds = array<i64: 1, 4, 128>}, {transform_indices = @transform_2, window_bounds = array<i64: 1, 4, 128>}, {pipeline_mode = #tpu.pipeline_mode<synchronous>, transform_indices = @transform_3, window_bounds = array<i64: 3, 8, 4>}, {transform_indices = @transform_4, window_bounds = array<i64: 1, 8, 2>}]} {
    %c128_i32 = arith.constant 128 : i32
    %0 = arith.muli %arg1, %c128_i32 : i32
    %1 = tpu.iota {dimensions = array<i32: 1>} : vector<1x128xi32>
    %2 = tpu.iota {dimensions = array<i32: 1>} : vector<1x128xi32>
    %c128_i32_0 = arith.constant 128 : i32
    %3 = arith.subi %0, %c128_i32_0 : i32
    %4 = vector.broadcast %3 : i32 to vector<1x128xi32>
    %5 = arith.addi %1, %4 : vector<1x128xi32>
    %6 = vector.broadcast %0 : i32 to vector<1x128xi32>
    %7 = arith.addi %2, %6 : vector<1x128xi32>
    %c128_i32_1 = arith.constant 128 : i32
    %8 = arith.addi %0, %c128_i32_1 : i32
    %9 = vector.broadcast %8 : i32 to vector<1x128xi32>
    %10 = arith.addi %1, %9 : vector<1x128xi32>
    %c0_i32 = arith.constant 0 : i32
    %11 = vector.broadcast %c0_i32 : i32 to vector<1x128xi32>
    %12 = arith.cmpi sge, %5, %11 : vector<1x128xi32>
    %c16_i32 = arith.constant 16 : i32
    %13 = vector.broadcast %c16_i32 : i32 to vector<1x128xi32>
    %14 = arith.cmpi slt, %5, %13 : vector<1x128xi32>
    %15 = arith.andi %12, %14 : vector<1x128xi1>
    %c0 = arith.constant 0 : index
    %c0_2 = arith.constant 0 : index
    %c0_3 = arith.constant 0 : index
    %16 = vector.load %arg2[%c0, %c0_2, %c0_3] : memref<1x4x128xf32, #tpu.memory_space<vmem>>, vector<1x4x128xf32>
    %17 = vector.shape_cast %16 : vector<1x4x128xf32> to vector<4x128xf32>
    %cst = arith.constant 0.000000e+00 : f32
    %18 = vector.shape_cast %15 : vector<1x128xi1> to vector<1x128xi1>
    %19 = vector.broadcast %18 : vector<1x128xi1> to vector<4x128xi1>
    %20 = vector.broadcast %cst : f32 to vector<4x128xf32>
    %21 = arith.select %19, %17, %20 : vector<4x128xi1>, vector<4x128xf32>
    %c16_i32_4 = arith.constant 16 : i32
    %22 = vector.broadcast %c16_i32_4 : i32 to vector<1x128xi32>
    %23 = arith.cmpi slt, %7, %22 : vector<1x128xi32>
    %c0_5 = arith.constant 0 : index
    %c0_6 = arith.constant 0 : index
    %c0_7 = arith.constant 0 : index
    %24 = vector.load %arg3[%c0_5, %c0_6, %c0_7] : memref<1x4x128xf32, #tpu.memory_space<vmem>>, vector<1x4x128xf32>
    %25 = vector.shape_cast %24 : vector<1x4x128xf32> to vector<4x128xf32>
    %cst_8 = arith.constant 0.000000e+00 : f32
    %26 = vector.shape_cast %23 : vector<1x128xi1> to vector<1x128xi1>
    %27 = vector.broadcast %26 : vector<1x128xi1> to vector<4x128xi1>
    %28 = vector.broadcast %cst_8 : f32 to vector<4x128xf32>
    %29 = arith.select %27, %25, %28 : vector<4x128xi1>, vector<4x128xf32>
    %c16_i32_9 = arith.constant 16 : i32
    %30 = vector.broadcast %c16_i32_9 : i32 to vector<1x128xi32>
    %31 = arith.cmpi slt, %10, %30 : vector<1x128xi32>
    %c0_10 = arith.constant 0 : index
    %c0_11 = arith.constant 0 : index
    %c0_12 = arith.constant 0 : index
    %32 = vector.load %arg4[%c0_10, %c0_11, %c0_12] : memref<1x4x128xf32, #tpu.memory_space<vmem>>, vector<1x4x128xf32>
    %33 = vector.shape_cast %32 : vector<1x4x128xf32> to vector<4x128xf32>
    %cst_13 = arith.constant 0.000000e+00 : f32
    %34 = vector.shape_cast %31 : vector<1x128xi1> to vector<1x128xi1>
    %35 = vector.broadcast %34 : vector<1x128xi1> to vector<4x128xi1>
    %36 = vector.broadcast %cst_13 : f32 to vector<4x128xf32>
    %37 = arith.select %35, %33, %36 : vector<4x128xi1>, vector<4x128xf32>
    %38 = tpu.concatenate %21, %29, %37 in 1 : vector<4x128xf32>, vector<4x128xf32>, vector<4x128xf32> -> vector<4x384xf32>
    %39 = vector.extract_strided_slice %38 {offsets = [0, 127], sizes = [4, 128], strides = [1, 1]} : vector<4x384xf32> to vector<4x128xf32>
    %40 = vector.extract_strided_slice %38 {offsets = [0, 128], sizes = [4, 128], strides = [1, 1]} : vector<4x384xf32> to vector<4x128xf32>
    %41 = vector.extract_strided_slice %38 {offsets = [0, 129], sizes = [4, 128], strides = [1, 1]} : vector<4x384xf32> to vector<4x128xf32>
    %cst_14 = arith.constant 0.000000e+00 : f32
    %42 = vector.broadcast %cst_14 : f32 to vector<8x128xf32>
    %c0_15 = arith.constant 0 : index
    %c0_16 = arith.constant 0 : index
    %c0_17 = arith.constant 0 : index
    %43 = vector.load %arg5[%c0_15, %c0_16, %c0_17] : memref<3x8x4xf32, #tpu.memory_space<vmem>>, vector<1x8x4xf32>
    %44 = vector.shape_cast %43 : vector<1x8x4xf32> to vector<8x4xf32>
    %cst_18 = arith.constant dense<0.000000e+00> : vector<8x128xf32>
    %45 = tpu.matmul %44, %39, %cst_18 {dimension_numbers = #tpu.dot_dimension_numbers<[1], [0], [0], [1], [0, 0, 1, 1], [], []>} : vector<8x4xf32>, vector<4x128xf32>, vector<8x128xf32> -> vector<8x128xf32>
    %46 = arith.addf %42, %45 : vector<8x128xf32>
    %c1 = arith.constant 1 : index
    %c0_19 = arith.constant 0 : index
    %c0_20 = arith.constant 0 : index
    %47 = vector.load %arg5[%c1, %c0_19, %c0_20] : memref<3x8x4xf32, #tpu.memory_space<vmem>>, vector<1x8x4xf32>
    %48 = vector.shape_cast %47 : vector<1x8x4xf32> to vector<8x4xf32>
    %cst_21 = arith.constant dense<0.000000e+00> : vector<8x128xf32>
    %49 = tpu.matmul %48, %40, %cst_21 {dimension_numbers = #tpu.dot_dimension_numbers<[1], [0], [0], [1], [0, 0, 1, 1], [], []>} : vector<8x4xf32>, vector<4x128xf32>, vector<8x128xf32> -> vector<8x128xf32>
    %50 = arith.addf %46, %49 : vector<8x128xf32>
    %c2 = arith.constant 2 : index
    %c0_22 = arith.constant 0 : index
    %c0_23 = arith.constant 0 : index
    %51 = vector.load %arg5[%c2, %c0_22, %c0_23] : memref<3x8x4xf32, #tpu.memory_space<vmem>>, vector<1x8x4xf32>
    %52 = vector.shape_cast %51 : vector<1x8x4xf32> to vector<8x4xf32>
    %cst_24 = arith.constant dense<0.000000e+00> : vector<8x128xf32>
    %53 = tpu.matmul %52, %41, %cst_24 {dimension_numbers = #tpu.dot_dimension_numbers<[1], [0], [0], [1], [0, 0, 1, 1], [], []>} : vector<8x4xf32>, vector<4x128xf32>, vector<8x128xf32> -> vector<8x128xf32>
    %54 = arith.addf %50, %53 : vector<8x128xf32>
    %55 = tpu.iota {dimensions = array<i32: 1>} : vector<1x128xi32>
    %c128_i32_25 = arith.constant 128 : i32
    %56 = arith.muli %arg1, %c128_i32_25 : i32
    %57 = vector.broadcast %56 : i32 to vector<1x128xi32>
    %58 = arith.addi %57, %55 : vector<1x128xi32>
    %c16_i32_26 = arith.constant 16 : i32
    %59 = vector.broadcast %c16_i32_26 : i32 to vector<1x128xi32>
    %60 = arith.cmpi slt, %58, %59 : vector<1x128xi32>
    %cst_27 = arith.constant 0.000000e+00 : f32
    %61 = vector.shape_cast %60 : vector<1x128xi1> to vector<1x128xi1>
    %62 = vector.broadcast %61 : vector<1x128xi1> to vector<8x128xi1>
    %63 = vector.broadcast %cst_27 : f32 to vector<8x128xf32>
    %64 = arith.select %62, %54, %63 : vector<8x128xi1>, vector<8x128xf32>
    %cst_28 = arith.constant dense<0.000000e+00> : vector<8xf32>
    %65 = vector.multi_reduction <add>, %64, %cst_28 [1] : vector<8x128xf32> to vector<8xf32>
    %66 = vector.shape_cast %65 : vector<8xf32> to vector<8x1xf32>
    %67 = arith.mulf %64, %64 : vector<8x128xf32>
    %cst_29 = arith.constant dense<0.000000e+00> : vector<8xf32>
    %68 = vector.multi_reduction <add>, %67, %cst_29 [1] : vector<8x128xf32> to vector<8xf32>
    %69 = vector.shape_cast %68 : vector<8xf32> to vector<8x1xf32>
    %70 = tpu.concatenate %66, %69 in 1 : vector<8x1xf32>, vector<8x1xf32> -> vector<8x2xf32>
    %c0_i32_30 = arith.constant 0 : i32
    %71 = arith.cmpi eq, %arg1, %c0_i32_30 : i32
    %72 = arith.extui %71 : i1 to i32
    %c0_i32_31 = arith.constant 0 : i32
    %73 = arith.cmpi ne, %72, %c0_i32_31 : i32
    scf.if %73 {
      %c0_34 = arith.constant 0 : index
      %c0_35 = arith.constant 0 : index
      %c0_36 = arith.constant 0 : index
      %77 = vector.load %arg6[%c0_34, %c0_35, %c0_36] : memref<1x8x2xf32, #tpu.memory_space<vmem>>, vector<1x8x2xf32>
      %78 = vector.shape_cast %77 : vector<1x8x2xf32> to vector<8x2xf32>
      %79 = vector.shape_cast %70 : vector<8x2xf32> to vector<1x8x2xf32>
      tpu.vector_store %arg6[%c0_34, %c0_35, %c0_36], %79 {strides = array<i32>} : memref<1x8x2xf32, #tpu.memory_space<vmem>>, vector<1x8x2xf32>,
    } else {
    }
    %c0_i32_32 = arith.constant 0 : i32
    %74 = arith.cmpi sgt, %arg1, %c0_i32_32 : i32
    %75 = arith.extui %74 : i1 to i32
    %c0_i32_33 = arith.constant 0 : i32
    %76 = arith.cmpi ne, %75, %c0_i32_33 : i32
    scf.if %76 {
      %c0_34 = arith.constant 0 : index
      %c0_35 = arith.constant 0 : index
      %c0_36 = arith.constant 0 : index
      %77 = vector.load %arg6[%c0_34, %c0_35, %c0_36] : memref<1x8x2xf32, #tpu.memory_space<vmem>>, vector<1x8x2xf32>
      %78 = vector.shape_cast %77 : vector<1x8x2xf32> to vector<8x2xf32>
      %79 = arith.addf %78, %70 : vector<8x2xf32>
      %c0_37 = arith.constant 0 : index
      %c0_38 = arith.constant 0 : index
      %c0_39 = arith.constant 0 : index
      %80 = vector.load %arg6[%c0_37, %c0_38, %c0_39] : memref<1x8x2xf32, #tpu.memory_space<vmem>>, vector<1x8x2xf32>
      %81 = vector.shape_cast %80 : vector<1x8x2xf32> to vector<8x2xf32>
      %82 = vector.shape_cast %79 : vector<8x2xf32> to vector<1x8x2xf32>
      tpu.vector_store %arg6[%c0_37, %c0_38, %c0_39], %82 {strides = array<i32>} : memref<1x8x2xf32, #tpu.memory_space<vmem>>, vector<1x8x2xf32>,
    } else {
    }
    return
  }
  func.func @transform_0(%arg0: i32, %arg1: i32) -> (i32, i32, i32) {
    %c1_i32 = arith.constant 1 : i32
    %0 = arith.muli %arg1, %c1_i32 : i32
    %c1_i32_0 = arith.constant 1 : i32
    %1 = arith.subi %0, %c1_i32_0 : i32
    %c0_i32 = arith.constant 0 : i32
    %2 = arith.maxsi %1, %c0_i32 : i32
    %c0_i32_1 = arith.constant 0 : i32
    %3 = arith.minsi %2, %c0_i32_1 : i32
    %c0_i32_2 = arith.constant 0 : i32
    %c0_i32_3 = arith.constant 0 : i32
    return %arg0, %c0_i32_2, %3 : i32, i32, i32
  }
  func.func @transform_1(%arg0: i32, %arg1: i32) -> (i32, i32, i32) {
    %c0_i32 = arith.constant 0 : i32
    %0 = arith.minsi %arg1, %c0_i32 : i32
    %c0_i32_0 = arith.constant 0 : i32
    %c0_i32_1 = arith.constant 0 : i32
    return %arg0, %c0_i32_0, %0 : i32, i32, i32
  }
  func.func @transform_2(%arg0: i32, %arg1: i32) -> (i32, i32, i32) {
    %c1_i32 = arith.constant 1 : i32
    %0 = arith.addi %arg1, %c1_i32 : i32
    %c1_i32_0 = arith.constant 1 : i32
    %1 = arith.muli %0, %c1_i32_0 : i32
    %c0_i32 = arith.constant 0 : i32
    %2 = arith.minsi %1, %c0_i32 : i32
    %c0_i32_1 = arith.constant 0 : i32
    %c0_i32_2 = arith.constant 0 : i32
    return %arg0, %c0_i32_1, %2 : i32, i32, i32
  }
  func.func @transform_3(%arg0: i32, %arg1: i32) -> (i32, i32, i32) {
    %c0_i32 = arith.constant 0 : i32
    %c0_i32_0 = arith.constant 0 : i32
    %c0_i32_1 = arith.constant 0 : i32
    %c0_i32_2 = arith.constant 0 : i32
    return %c0_i32, %c0_i32_0, %c0_i32_1 : i32, i32, i32
  }
  func.func @transform_4(%arg0: i32, %arg1: i32) -> (i32, i32, i32) {
    %c0_i32 = arith.constant 0 : i32
    %c0_i32_0 = arith.constant 0 : i32
    %c0_i32_1 = arith.constant 0 : i32
    return %arg0, %c0_i32, %c0_i32_0 : i32, i32, i32
  }
}

module attributes {stable_mosaic.version = 11 : i64} {
  func.func @kernel(%arg0: i32, %arg1: i32, %arg2: memref<1x4x128xf32, #tpu.memory_space<vmem>>, %arg3: memref<1x4x128xf32, #tpu.memory_space<vmem>>, %arg4: memref<1x4x128xf32, #tpu.memory_space<vmem>>, %arg5: memref<3x8x4xf32, #tpu.memory_space<vmem>>, %arg6: memref<8x1xf32, #tpu.memory_space<vmem>>, %arg7: memref<1x8x128xf32, #tpu.memory_space<vmem>>) attributes {dimension_semantics = [#tpu.dimension_semantics<parallel>, #tpu.dimension_semantics<parallel>], iteration_bounds = array<i64: 2, 1>, scalar_prefetch = 0 : i64, scratch_operands = 0 : i64, tpu.core_type = #tpu.core_type<tc>, window_params = [{transform_indices = @transform_0, window_bounds = array<i64: 1, 4, 128>}, {transform_indices = @transform_1, window_bounds = array<i64: 1, 4, 128>}, {transform_indices = @transform_2, window_bounds = array<i64: 1, 4, 128>}, {pipeline_mode = #tpu.pipeline_mode<synchronous>, transform_indices = @transform_3, window_bounds = array<i64: 3, 8, 4>}, {pipeline_mode = #tpu.pipeline_mode<synchronous>, transform_indices = @transform_4, window_bounds = array<i64: 8, 1>}, {transform_indices = @transform_5, window_bounds = array<i64: 1, 8, 128>}]} {
    %c128_i32 = arith.constant 128 : i32
    %0 = arith.muli %arg1, %c128_i32 : i32
    %1 = tpu.iota {dimensions = array<i32: 1>} : vector<1x128xi32>
    %2 = tpu.iota {dimensions = array<i32: 1>} : vector<1x128xi32>
    %c128_i32_0 = arith.constant 128 : i32
    %3 = arith.subi %0, %c128_i32_0 : i32
    %4 = vector.broadcast %3 : i32 to vector<1x128xi32>
    %5 = arith.addi %1, %4 : vector<1x128xi32>
    %6 = vector.broadcast %0 : i32 to vector<1x128xi32>
    %7 = arith.addi %2, %6 : vector<1x128xi32>
    %c128_i32_1 = arith.constant 128 : i32
    %8 = arith.addi %0, %c128_i32_1 : i32
    %9 = vector.broadcast %8 : i32 to vector<1x128xi32>
    %10 = arith.addi %1, %9 : vector<1x128xi32>
    %c0_i32 = arith.constant 0 : i32
    %11 = vector.broadcast %c0_i32 : i32 to vector<1x128xi32>
    %12 = arith.cmpi sge, %5, %11 : vector<1x128xi32>
    %c16_i32 = arith.constant 16 : i32
    %13 = vector.broadcast %c16_i32 : i32 to vector<1x128xi32>
    %14 = arith.cmpi slt, %5, %13 : vector<1x128xi32>
    %15 = arith.andi %12, %14 : vector<1x128xi1>
    %c0 = arith.constant 0 : index
    %c0_2 = arith.constant 0 : index
    %c0_3 = arith.constant 0 : index
    %16 = vector.load %arg2[%c0, %c0_2, %c0_3] : memref<1x4x128xf32, #tpu.memory_space<vmem>>, vector<1x4x128xf32>
    %17 = vector.shape_cast %16 : vector<1x4x128xf32> to vector<4x128xf32>
    %cst = arith.constant 0.000000e+00 : f32
    %18 = vector.shape_cast %15 : vector<1x128xi1> to vector<1x128xi1>
    %19 = vector.broadcast %18 : vector<1x128xi1> to vector<4x128xi1>
    %20 = vector.broadcast %cst : f32 to vector<4x128xf32>
    %21 = arith.select %19, %17, %20 : vector<4x128xi1>, vector<4x128xf32>
    %c16_i32_4 = arith.constant 16 : i32
    %22 = vector.broadcast %c16_i32_4 : i32 to vector<1x128xi32>
    %23 = arith.cmpi slt, %7, %22 : vector<1x128xi32>
    %c0_5 = arith.constant 0 : index
    %c0_6 = arith.constant 0 : index
    %c0_7 = arith.constant 0 : index
    %24 = vector.load %arg3[%c0_5, %c0_6, %c0_7] : memref<1x4x128xf32, #tpu.memory_space<vmem>>, vector<1x4x128xf32>
    %25 = vector.shape_cast %24 : vector<1x4x128xf32> to vector<4x128xf32>
    %cst_8 = arith.constant 0.000000e+00 : f32
    %26 = vector.shape_cast %23 : vector<1x128xi1> to vector<1x128xi1>
    %27 = vector.broadcast %26 : vector<1x128xi1> to vector<4x128xi1>
    %28 = vector.broadcast %cst_8 : f32 to vector<4x128xf32>
    %29 = arith.select %27, %25, %28 : vector<4x128xi1>, vector<4x128xf32>
    %c16_i32_9 = arith.constant 16 : i32
    %30 = vector.broadcast %c16_i32_9 : i32 to vector<1x128xi32>
    %31 = arith.cmpi slt, %10, %30 : vector<1x128xi32>
    %c0_10 = arith.constant 0 : index
    %c0_11 = arith.constant 0 : index
    %c0_12 = arith.constant 0 : index
    %32 = vector.load %arg4[%c0_10, %c0_11, %c0_12] : memref<1x4x128xf32, #tpu.memory_space<vmem>>, vector<1x4x128xf32>
    %33 = vector.shape_cast %32 : vector<1x4x128xf32> to vector<4x128xf32>
    %cst_13 = arith.constant 0.000000e+00 : f32
    %34 = vector.shape_cast %31 : vector<1x128xi1> to vector<1x128xi1>
    %35 = vector.broadcast %34 : vector<1x128xi1> to vector<4x128xi1>
    %36 = vector.broadcast %cst_13 : f32 to vector<4x128xf32>
    %37 = arith.select %35, %33, %36 : vector<4x128xi1>, vector<4x128xf32>
    %38 = tpu.concatenate %21, %29, %37 in 1 : vector<4x128xf32>, vector<4x128xf32>, vector<4x128xf32> -> vector<4x384xf32>
    %39 = vector.extract_strided_slice %38 {offsets = [0, 127], sizes = [4, 128], strides = [1, 1]} : vector<4x384xf32> to vector<4x128xf32>
    %40 = vector.extract_strided_slice %38 {offsets = [0, 128], sizes = [4, 128], strides = [1, 1]} : vector<4x384xf32> to vector<4x128xf32>
    %41 = vector.extract_strided_slice %38 {offsets = [0, 129], sizes = [4, 128], strides = [1, 1]} : vector<4x384xf32> to vector<4x128xf32>
    %cst_14 = arith.constant 0.000000e+00 : f32
    %42 = vector.broadcast %cst_14 : f32 to vector<8x128xf32>
    %c0_15 = arith.constant 0 : index
    %c0_16 = arith.constant 0 : index
    %c0_17 = arith.constant 0 : index
    %43 = vector.load %arg5[%c0_15, %c0_16, %c0_17] : memref<3x8x4xf32, #tpu.memory_space<vmem>>, vector<1x8x4xf32>
    %44 = vector.shape_cast %43 : vector<1x8x4xf32> to vector<8x4xf32>
    %cst_18 = arith.constant dense<0.000000e+00> : vector<8x128xf32>
    %45 = tpu.matmul %44, %39, %cst_18 {dimension_numbers = #tpu.dot_dimension_numbers<[1], [0], [0], [1], [0, 0, 1, 1], [], []>} : vector<8x4xf32>, vector<4x128xf32>, vector<8x128xf32> -> vector<8x128xf32>
    %46 = arith.addf %42, %45 : vector<8x128xf32>
    %c1 = arith.constant 1 : index
    %c0_19 = arith.constant 0 : index
    %c0_20 = arith.constant 0 : index
    %47 = vector.load %arg5[%c1, %c0_19, %c0_20] : memref<3x8x4xf32, #tpu.memory_space<vmem>>, vector<1x8x4xf32>
    %48 = vector.shape_cast %47 : vector<1x8x4xf32> to vector<8x4xf32>
    %cst_21 = arith.constant dense<0.000000e+00> : vector<8x128xf32>
    %49 = tpu.matmul %48, %40, %cst_21 {dimension_numbers = #tpu.dot_dimension_numbers<[1], [0], [0], [1], [0, 0, 1, 1], [], []>} : vector<8x4xf32>, vector<4x128xf32>, vector<8x128xf32> -> vector<8x128xf32>
    %50 = arith.addf %46, %49 : vector<8x128xf32>
    %c2 = arith.constant 2 : index
    %c0_22 = arith.constant 0 : index
    %c0_23 = arith.constant 0 : index
    %51 = vector.load %arg5[%c2, %c0_22, %c0_23] : memref<3x8x4xf32, #tpu.memory_space<vmem>>, vector<1x8x4xf32>
    %52 = vector.shape_cast %51 : vector<1x8x4xf32> to vector<8x4xf32>
    %cst_24 = arith.constant dense<0.000000e+00> : vector<8x128xf32>
    %53 = tpu.matmul %52, %41, %cst_24 {dimension_numbers = #tpu.dot_dimension_numbers<[1], [0], [0], [1], [0, 0, 1, 1], [], []>} : vector<8x4xf32>, vector<4x128xf32>, vector<8x128xf32> -> vector<8x128xf32>
    %54 = arith.addf %50, %53 : vector<8x128xf32>
    %c0_25 = arith.constant 0 : index
    %c0_26 = arith.constant 0 : index
    %55 = vector.load %arg6[%c0_25, %c0_26] : memref<8x1xf32, #tpu.memory_space<vmem>>, vector<8x1xf32>
    %56 = vector.broadcast %55 : vector<8x1xf32> to vector<8x128xf32>
    %57 = arith.addf %54, %56 : vector<8x128xf32>
    %cst_27 = arith.constant 0.000000e+00 : f32
    %58 = vector.broadcast %cst_27 : f32 to vector<8x128xf32>
    %59 = arith.maximumf %57, %58 : vector<8x128xf32>
    %c0_28 = arith.constant 0 : index
    %c0_29 = arith.constant 0 : index
    %c0_30 = arith.constant 0 : index
    %60 = vector.load %arg7[%c0_28, %c0_29, %c0_30] : memref<1x8x128xf32, #tpu.memory_space<vmem>>, vector<1x8x128xf32>
    %61 = vector.shape_cast %60 : vector<1x8x128xf32> to vector<8x128xf32>
    %62 = vector.shape_cast %59 : vector<8x128xf32> to vector<1x8x128xf32>
    tpu.vector_store %arg7[%c0_28, %c0_29, %c0_30], %62 {strides = array<i32>} : memref<1x8x128xf32, #tpu.memory_space<vmem>>, vector<1x8x128xf32>,
    return
  }
  func.func @transform_0(%arg0: i32, %arg1: i32) -> (i32, i32, i32) {
    %c1_i32 = arith.constant 1 : i32
    %0 = arith.muli %arg1, %c1_i32 : i32
    %c1_i32_0 = arith.constant 1 : i32
    %1 = arith.subi %0, %c1_i32_0 : i32
    %c0_i32 = arith.constant 0 : i32
    %2 = arith.maxsi %1, %c0_i32 : i32
    %c0_i32_1 = arith.constant 0 : i32
    %3 = arith.minsi %2, %c0_i32_1 : i32
    %c0_i32_2 = arith.constant 0 : i32
    %c0_i32_3 = arith.constant 0 : i32
    return %arg0, %c0_i32_2, %3 : i32, i32, i32
  }
  func.func @transform_1(%arg0: i32, %arg1: i32) -> (i32, i32, i32) {
    %c0_i32 = arith.constant 0 : i32
    %0 = arith.minsi %arg1, %c0_i32 : i32
    %c0_i32_0 = arith.constant 0 : i32
    %c0_i32_1 = arith.constant 0 : i32
    return %arg0, %c0_i32_0, %0 : i32, i32, i32
  }
  func.func @transform_2(%arg0: i32, %arg1: i32) -> (i32, i32, i32) {
    %c1_i32 = arith.constant 1 : i32
    %0 = arith.addi %arg1, %c1_i32 : i32
    %c1_i32_0 = arith.constant 1 : i32
    %1 = arith.muli %0, %c1_i32_0 : i32
    %c0_i32 = arith.constant 0 : i32
    %2 = arith.minsi %1, %c0_i32 : i32
    %c0_i32_1 = arith.constant 0 : i32
    %c0_i32_2 = arith.constant 0 : i32
    return %arg0, %c0_i32_1, %2 : i32, i32, i32
  }
  func.func @transform_3(%arg0: i32, %arg1: i32) -> (i32, i32, i32) {
    %c0_i32 = arith.constant 0 : i32
    %c0_i32_0 = arith.constant 0 : i32
    %c0_i32_1 = arith.constant 0 : i32
    %c0_i32_2 = arith.constant 0 : i32
    return %c0_i32, %c0_i32_0, %c0_i32_1 : i32, i32, i32
  }
  func.func @transform_4(%arg0: i32, %arg1: i32) -> (i32, i32) {
    %c0_i32 = arith.constant 0 : i32
    %c0_i32_0 = arith.constant 0 : i32
    %c0_i32_1 = arith.constant 0 : i32
    return %c0_i32, %c0_i32_0 : i32, i32
  }
  func.func @transform_5(%arg0: i32, %arg1: i32) -> (i32, i32, i32) {
    %c0_i32 = arith.constant 0 : i32
    %c0_i32_0 = arith.constant 0 : i32
    return %arg0, %c0_i32, %arg1 : i32, i32, i32
  }
}

</mosaic_0001>

<bundles_post_ra>
// kernel: stem_block.3
= control target key start
LH: loop header
LB: loop body
LE: loop exit
PB: predicated region body
PF: predicated region fallthrough
CT: control target
= control target key end

     0   :  { %10 = vsyncpa [#allocation3], 0  ;;  %s1124_s0 = inlined_call_operand.vmem [shape: f32[2,4,16], index: 0, kind: input, shape index: {}, may-alias: {0,1,2}]   ;;  %s1125_s1 = inlined_call_operand.vmem [shape: f32[2,4,16], index: 1, kind: input, shape index: {}, may-alias: {0,1,2}]   ;;  %s1126_s2 = inlined_call_operand.vmem [shape: f32[2,4,16], index: 2, kind: input, shape index: {}, may-alias: {0,1,2}]   ;;  %s1127_s3 = inlined_call_operand.vmem [shape: f32[3,8,4], index: 3, kind: input, shape index: {}]   ;;  %s1128_s4 = inlined_call_operand.vmem [shape: f32[8,1], index: 4, kind: input, shape index: {}]   ;;  %s1129_s5 = inlined_call_operand.hbm [shape: f32[2,8,16], index: 5, kind: output, shape index: {}]  }
   0x1   :  { %12 = vsyncpa [#allocation3 + $0x1], 0  ;;  %s991_s18 = smov 0   ;;  %s993_s0 = smov 0  }
   0x2   :  { %s995_s19 = smov 0   ;;  %s997_s20 = smov 0  }
   0x3   :  { %s999_s2 = smov 0   ;;  %s1001_s21 = smov 0  }
   0x4 LB: > { %s772_s22 = sadd.s32 4294967295, %s953_s21   ;;  %s773_s23 = sadd.s32 4294967294, %s953_s21   ;;  %s953_s21 = sphi %s1001_s21, %s18_s21   ;;  %s949_s2 = sphi %s999_s2, %s1136_s2   ;;  %s945_s20 = sphi %s997_s20, %s1135_s20   ;;  %s941_s19 = sphi %s995_s19, %s1134_s19   ;;  %s937_s0 = sphi %s993_s0, %s1133_s0   ;;  %s933_s18 = sphi %s991_s18, %s1132_s18  }
   0x5   : > { %s30_s24 = sadd.s32 1, %s949_s2  ;;  %s185_s25 = sadd.s32 1, %s941_s19 }
   0x6   : > { %p32_p0 = scmp.ge.s32.totalorder %s30_s24, 2  ;;  %p195_p1 = scmp.ne.s32.totalorder %s941_s19, %s937_s0 }
   0x7   : > { %p196_p2 = scmp.eq.s32.totalorder %s772_s22, 1  ;;  %p201_p3 = scmp.ne.s32.totalorder %s937_s0, %s933_s18 }
   0x8   : > { %s1138_s24 = smov (%p32_p0, %s30_s24), 0  ;;  %p202_p5 = scmp.eq.s32.totalorder %s773_s23, 1 }
   0x9   : > { %p1031_p4 = por %p196_p2, %p195_p1  ;;  %s180_s27 = ssub.s32 %s949_s2, %s1138_s24 }
   0xa   : > { %p776_p6 = scmp.ge.s32.totalorder %s953_s21, 1  ;;  %p183_p7 = scmp.eq.s32.totalorder %s180_s27, 0 }
   0xb   : > { %p1038_p8 = por %p202_p5, %p201_p3  ;;  %p276_p9 = scmp.lt.s32.totalorder %s953_s21, 3 }
   0xc   : > { %s1044_s29 = scalar_select %p183_p7, %s941_s19, %s185_s25  }
   0xd   : > { %p277_p10 = pnand %p776_p6, %p276_p9 }
   0xe   : > { %p349_p11 = scmp.lt.s32.totalorder (!%p277_p10), %s945_s20, 1  ;;  %v372_v0 = vlaneseq (!%p277_p10)  ;;  %v955_v1 = vmov (!%p277_p10), 0.0   ;;  %s956_s30 = smov (!%p277_p10), 1   ;;  %vm957_vm0 = vmmov (!%p277_p10), 0   ;;  %v958_v3 = vmov (!%p277_p10), 0   ;;  %v781_v6 = vld [vmem:[%s1127_s3 + $0x8] sm:$0xff] (!%p277_p10) }
   0xf   : > { %280 = sbr.rel (%p277_p10) target bundleno = 381 (0x17d), region = 40  ;;  %481 = vrot.lane.b32.xlu0 (!%p277_p10), %v955_v1, %s956_s30  ;;  %799 = vmatprep.subr.mxu0 (!%p277_p10), %v955_v1  ;;  %vm406_vm2 = vcmask (!%p277_p10), 1043456   ;;  %vm402_vm3 = vcmask (!%p277_p10), 31744   ;;  %s959_s13 = smov (!%p277_p10), 127   ;;  %v647_v7 = vld [vmem:[%s1128_s4] sm:$0xff] (!%p277_p10)  ;;  %vm485_vm4 = vcmask (!%p277_p10), 7168  }
  0x10   : > { %v373_v2 = vand.u32 (!%p277_p10), 127, %v372_v0  ;;  %804 = vmatprep.subr.mxu1 (!%p277_p10), %v955_v1  ;;  %801 = vmatprep.mubr.msk.f32.mxu0 (!%p277_p10), %vm957_vm0, %v955_v1  ;;  %v399_v11 = vld [vmem:[%s1127_s3] sm:$0xff] (!%p277_p10)  ;;  %vm569_vm5 = vcmask (!%p277_p10), 1039360   ;;  %v786_v14 = vld [vmem:[%s1127_s3 + $0x10] sm:$0xff] (!%p277_p10)  ;;  %s327_s25 = sand.u32 (!%p277_p10), 1, %s937_s0  }
  0x11   : > { %806 = vmatprep.mubr.msk.f32.mxu1 (!%p277_p10), %vm957_vm0, %v955_v1  ;;  %874 = vset.pattern.permute.xlu0 (!%p277_p10), %v958_v3  ;;  %s777_s27 = sshll.u32 (!%p277_p10), %s327_s25, 3  ;;  %s657_s11 = scalar_lea.sflag (!%p277_p10), [#allocation3], %s327_s25 }
  0x12   : > { %vm389_vm1 = vcmp.lt.s32.totalorder (!%p277_p10), %v373_v2, 16 }
  0x16   : > { %s350_s6 = scalar_select %p349_p11, %s945_s20, 1 }
  0x18   : > { %s779_s7 = sshll.u32 %s350_s6, 2  ;;  %s329_s6 = scalar_lea.vmem [#allocation2], %s777_s27 }
  0x19   : > { %s355_s10 = scalar_lea.vmem %s1125_s1, %s779_s7  ;;  %s671_s7 = sshll.u32 %s329_s6, 4  ;;  %s1079_s7 = int_to_ptr.vmem [resolvable:$true] %s671_s7 }
  0x1a   : > { %v390_v4 = vld [vmem:[%s355_s10] sm:$0xf]  ;;  %s875_s12 = scalar_lea.vmem %s1079_s7, 128 }
  0x1b   : > { %v393_v5 = vsel %vm389_vm1, %v390_v4, 0.0  ;;  %p876_p12 = scmp.ne.s32.totalorder %s1079_s7, %s875_s12 }
  0x1c   : > { %565 = vrot.lane.b32.xlu1 %v393_v5, %s959_s13  ;;  %483 = vrot.lane.b32.xlu0 %v393_v5, %s956_s30  ;;  %s790_s30 = sshll.u32 %s945_s20, 7  ;;  %s960_s20 = smov [#allocation2]  }
  0x1d   : > { %800 = vmatpush3.msk.msra.mxu0 %vm406_vm2, %v393_v5  ;;  %s1077_s10 = scalar_lea.hbm %s1129_s5, %s790_s30  ;;  %p877_p13 = pnand %p876_p12, %p1031_p4 }
  0x1e   : > { %802 = vmatmul.mubr.msk.f32.vlgmr.msra.gmra.mrb[0].mxu0 %vm402_vm3, %v781_v6  ;;  %809 = vmatprep.subr.mxu0 %v955_v1 }
  0x1f   : > { %811 = vmatprep.mubr.msk.f32.mxu0 %vm957_vm0, %v955_v1  ;;  %p878_p0 = pneg %p877_p13 }
  0x20   : > { %567 = vrot.lane.b32.xlu1 %v955_v1, %s959_s13  ;;  %650 = vperm.xlu0 %874, %v647_v7   ;;  %s879_s13 = sshll.u32 %s960_s20, 4  ;;  %s880_s13 = int_to_ptr.vmem [resolvable:$false] %s879_s13 }
  0x21   : > { %s881_s14 = scalar_lea.vmem %s880_s13, 256  ;;  %p882_p1 = scmp.lt.s32.totalorder %s1079_s7, %s880_s13 }
  0x22   : > { %p883_p2 = scmp.lt.s32.totalorder %s881_s14, %s875_s12 }
  0x24   : > { %p884_p3 = por %p883_p2, %p882_p1 }
  0x26   : > { %p885_p5 = pnand %p884_p3, %p878_p0 }
  0x81   : > { %v482_v8 = vpop.permute.xlu0 %481 }
  0x8e   : > { %v566_v9 = vpop.permute.xlu1 %565  ;;  %v484_v10 = vpop.permute.xlu0 %483 }
  0x8f   : > { %v486_v12 = vsel %vm485_vm4, %v482_v8, %v484_v10 }
  0x90   : > { %805 = vmatpush3.msk.msra.mxu1 %vm406_vm2, %v486_v12 }
  0x91   : > { %807 = vmatmul.mubr.msk.f32.vlgmr.msra.gmra.mrb[0].mxu1 %vm402_vm3, %v399_v11 }
  0x92   : > { %v568_v13 = vpop.permute.xlu1 %567 }
  0x93   : > { %v570_v15 = vsel %vm569_vm5, %v566_v9, %v568_v13 }
  0x94   : > { %810 = vmatpush3.msk.msra.mxu0 %vm406_vm2, %v570_v15 }
  0x95   : > { %812 = vmatmul.mubr.msk.f32.vlgmr.msra.gmra.mrb[2].mxu0 %vm402_vm3, %v786_v14 }
  0x9f   : > { %v651_v22 = vpop.permute.xlu0 %650 }
  0xf1   : > { %v476_v16 = vpop.f32.mrb[0].mxu0 }
  0xf2   : > { %v803_v17 = vpop.f32.mrb[1].mxu0 }
 0x164   : > { %v558_v18 = vpop.f32.mrb[0].mxu1 }
 0x165   : > { %v559_v19 = vadd.f32 %v558_v18, %v476_v16  ;;  %v808_v20 = vpop.f32.mrb[1].mxu1 }
 0x168   : > { %v642_v21 = vpop.f32.mrb[2].mxu0 }
 0x169   : > { %v646_v23 = vadd.f32 %v642_v21, %v559_v19  ;;  %v813_v24 = vpop.f32.mrb[3].mxu0 }
 0x16b   : > { %v653_v25 = vadd.f32 %v651_v22, %v646_v23 }
 0x16d   : > { %v654_v26 = vmax.f32 %v653_v25, 0.0 }
 0x16f   : > { %655 = vst [vmem:[%s329_s6] sm:$0xff] %v654_v26 }
 0x170   : > { %888 = shalt.err (!%p885_p5)
}
 0x171   : > { %s889_s15 = scalar_lea.hbm %s1077_s10, 128  ;;  %s893_s22 = scalar_lea.hbm %s1129_s5, 256 }
 0x172   : > { %p890_p6 = scmp.ne.s32.totalorder %s1077_s10, %s889_s15  ;;  %p894_p10 = scmp.lt.u32.totalorder %s1077_s10, %s1129_s5 }
 0x173   : > { %p895_p11 = scmp.lt.u32.totalorder %s893_s22, %s889_s15  ;;  %p897_p13 = scmp.lt.u32.totalorder %s889_s15, %s1077_s10 }
 0x174   : > { %p891_p7 = pnand %p890_p6, %p1031_p4 }
 0x175   : > { %p896_p12 = por %p895_p11, %p894_p10 }
 0x176   : > { %p892_p9 = pneg %p891_p7 }
 0x177   : > { %p898_p0 = por %p897_p13, %p896_p12 }
 0x179   : > { %p899_p1 = pnand %p898_p0, %p892_p9 }
 0x17b   : > { %902 = shalt.err (!%p899_p1)
}
 0x17c   : > { %814 = dma.vmem_to_hbm [thread:$0]  (%p1031_p4), %s1079_s7, 128, %s1077_s10, %s657_s11  }
 0x17d PF: > { %p820_p2 = scmp.ge.s32.totalorder %s953_s21, 2  ;;  %s683_s27 = sand.u32 1, %s933_s18  }
 0x17e   : > { %s684_s30 = scalar_lea.sflag [#allocation3], %s683_s27 }
 0x17f   : > { %p817_p3 = pnand %p820_p2, %p1038_p8 }
 0x181   : > { %928 = dma.done.wait (!%p817_p3), %s684_s30, 128  }
 0x182   : > { %930 = vsyncadd (!%p817_p3), %s684_s30, 4294967168  ;;  %s18_s21 = sadd.s32 1, %s953_s21   ;;  %s1132_s18 = smov %s937_s0 }
 0x183   : > { %p15_p5 = scmp.ge.s32.totalorder %s18_s21, 4   ;;  %s1133_s0 = smov %s941_s19 }
 0x184   : > { %s1134_s19 = smov %s1044_s29  ;;  %s1135_s20 = smov %s949_s2 }
 0x185   : > { %s1136_s2 = smov %s1138_s24  ;;  %17 = sbr.rel (!%p15_p5) target bundleno = 4 (0x4), region = 83 }
 0x18c   :  { %689 = vsyncpa [#allocation3], 1 }
 0x18d   :  { %691 = vsyncpa [#allocation3 + $0x1], 1 }

// kernel: stem_block.2
= control target key start
LH: loop header
LB: loop body
LE: loop exit
PB: predicated region body
PF: predicated region fallthrough
CT: control target
= control target key end

     0   :  { %s857_s15 = smov 0   ;;  %s859_s16 = smov 0   ;;  %s916_s0 = inlined_call_operand.vmem [shape: f32[2,4,16], index: 0, kind: input, shape index: {}, may-alias: {0,1,2}]   ;;  %s917_s1 = inlined_call_operand.vmem [shape: f32[2,4,16], index: 1, kind: input, shape index: {}, may-alias: {0,1,2}]   ;;  %s918_s2 = inlined_call_operand.vmem [shape: f32[2,4,16], index: 2, kind: input, shape index: {}, may-alias: {0,1,2}]   ;;  %s919_s3 = inlined_call_operand.vmem [shape: f32[3,8,4], index: 3, kind: input, shape index: {}]   ;;  %s920_s4 = inlined_call_operand.vmem [shape: f32[2,8,2], index: 4, kind: output, shape index: {}]  }
   0x1   :  { %s861_s17 = smov 0  }
   0x2 LB: > { %s26_s0 = sadd.s32 1, %s822_s16  ;;  %p737_p0 = scmp.ge.s32.totalorder %s826_s17, 1  ;;  %s826_s17 = sphi %s861_s17, %s14_s17   ;;  %s822_s16 = sphi %s859_s16, %s922_s16   ;;  %s818_s15 = sphi %s857_s15, %s921_s15  }
   0x3   : > { %p28_p1 = scmp.ge.s32.totalorder %s26_s0, 2  ;;  %p246_p2 = scmp.lt.s32.totalorder %s826_s17, 3 }
   0x5   : > { %s924_s0 = smov (%p28_p1, %s26_s0), 0  ;;  %p247_p3 = pnand %p737_p0, %p246_p2 }
   0x6   : > { %p316_p4 = scmp.lt.s32.totalorder (!%p247_p3), %s818_s15, 1  ;;  %v343_v0 = vlaneseq (!%p247_p3)  ;;  %v828_v1 = vmov (!%p247_p3), 0.0   ;;  %s829_s2 = smov (!%p247_p3), 1   ;;  %vm830_vm0 = vmmov (!%p247_p3), 0   ;;  %v742_v5 = vld [vmem:[%s919_s3 + $0x8] sm:$0xff] (!%p247_p3)  ;;  %vm377_vm2 = vcmask (!%p247_p3), 1043456  }
   0x7   : > { %250 = sbr.rel (%p247_p3) target bundleno = 505 (0x1f9), region = 36  ;;  %452 = vrot.lane.b32.xlu0 (!%p247_p3), %v828_v1, %s829_s2  ;;  %763 = vmatprep.subr.mxu0 (!%p247_p3), %v828_v1  ;;  %s831_s24 = smov (!%p247_p3), 127   ;;  %vm373_vm3 = vcmask (!%p247_p3), 31744   ;;  %vm456_vm4 = vcmask (!%p247_p3), 7168   ;;  %v370_v9 = vld [vmem:[%s919_s3] sm:$0xff] (!%p247_p3)  ;;  %vm540_vm5 = vcmask (!%p247_p3), 1039360  }
   0x8   : > { %v344_v2 = vand.u32 (!%p247_p3), 127, %v343_v0  ;;  %765 = vmatprep.mubr.msk.f32.mxu0 (!%p247_p3), %vm830_vm0, %v828_v1  ;;  %758 = vmatprep.subr.mxu1 (!%p247_p3), %v828_v1  ;;  %v747_v13 = vld [vmem:[%s919_s3 + $0x10] sm:$0xff] (!%p247_p3)  ;;  %vm629_vm6 = vcmask (!%p247_p3), 15360  }
   0x9   : > { %760 = vmatprep.mubr.msk.f32.mxu1 (!%p247_p3), %vm830_vm0, %v828_v1 }
   0xa   : > { %vm360_vm1 = vcmp.lt.s32.totalorder (!%p247_p3), %v344_v2, 16 }
   0xe   : > { %s926_s15 = smov (!%p316_p4, %s818_s15), 1 }
   0xf   : > { %s739_s18 = sshll.u32 %s926_s15, 2  ;;  %s741_s29 = sshll.u32 %s926_s15, 3 }
  0x10   : > { %s322_s21 = scalar_lea.vmem %s917_s1, %s739_s18  ;;  %s341_s6 = scalar_lea.vmem %s920_s4, %s741_s29 }
  0x11   : > { %v361_v3 = vld [vmem:[%s322_s21] sm:$0xf] }
  0x12   : > { %v364_v4 = vsel %vm360_vm1, %v361_v3, 0.0 }
  0x13   : > { %536 = vrot.lane.b32.xlu1 %v364_v4, %s831_s24  ;;  %454 = vrot.lane.b32.xlu0 %v364_v4, %s829_s2 }
  0x14   : > { %759 = vmatpush3.msk.msra.mxu1 %vm377_vm2, %v364_v4 }
  0x15   : > { %761 = vmatmul.mubr.msk.f32.vlgmr.msra.gmra.mrb[0].mxu1 %vm373_vm3, %v742_v5 }
  0x17   : > { %538 = vrot.lane.b32.xlu1 %v828_v1, %s831_s24 }
  0x79   : > { %v453_v6 = vpop.permute.xlu0 %452 }
  0x85   : > { %v537_v7 = vpop.permute.xlu1 %536  ;;  %v455_v8 = vpop.permute.xlu0 %454 }
  0x86   : > { %v457_v10 = vsel %vm456_vm4, %v453_v6, %v455_v8 }
  0x87   : > { %764 = vmatpush3.msk.msra.mxu0 %vm377_vm2, %v457_v10 }
  0x88   : > { %766 = vmatmul.mubr.msk.f32.vlgmr.msra.gmra.mrb[0].mxu0 %vm373_vm3, %v370_v9  ;;  %768 = vmatprep.subr.mxu0 %v828_v1 }
  0x89   : > { %v539_v11 = vpop.permute.xlu1 %538  ;;  %770 = vmatprep.mubr.msk.f32.mxu0 %vm830_vm0, %v828_v1 }
  0x8a   : > { %v541_v12 = vsel %vm540_vm5, %v537_v7, %v539_v11 }
  0x8b   : > { %769 = vmatpush3.msk.msra.mxu0 %vm377_vm2, %v541_v12 }
  0x90   : > { %771 = vmatmul.mubr.msk.f32.vlgmr.msra.gmra.mrb[0].mxu0 %vm373_vm3, %v747_v13 }
  0xe8   : > { %v447_v14 = vpop.f32.mrb[0].mxu1 }
  0xe9   : > { %v762_v15 = vpop.f32.mrb[1].mxu1 }
 0x163   : > { %v613_v16 = vpop.f32.mrb[0].mxu0 }
 0x164   : > { %v773_v17 = vadd.f32 %v613_v16, %v447_v14  ;;  %v772_v18 = vpop.f32.mrb[1].mxu0 }
 0x166   : > { %v618_v19 = vsel %vm360_vm1, %v773_v17, 0.0 }
 0x167   : > { %619 = vadd.xlane.f32.xlu0 %v618_v19  ;;  %v621_v20 = vmul.f32 %v618_v19, %v618_v19 }
 0x169   : > { %622 = vadd.xlane.f32.xlu1 %v621_v20 }
 0x1f4   : > { %v620_v21 = vpop.xlane.xlu0 %619 }
 0x1f6   : > { %v623_v22 = vpop.xlane.xlu1 %622 }
 0x1f7   : > { %v624_v23 = vsel %vm456_vm4, %v620_v21, %v623_v22 }
 0x1f8   : > { %630 = vst.msk [vmem:[%s341_s6] sm:$0xff] %vm629_vm6, %v624_v23 }
 0x1f9 PF: > { %s14_s17 = sadd.s32 1, %s826_s17   ;;  %s921_s15 = smov %s822_s16 }
 0x1fa   : > { %p11_p5 = scmp.ge.s32.totalorder %s14_s17, 4   ;;  %s922_s16 = smov %s924_s0 }
 0x1fc   :  { %13 = sbr.rel (!%p11_p5) target bundleno = 2 (0x2), region = 82 }

</bundles_post_ra>
